<compile_context>
chip_gen: v7x
topology: tpu7x:2x2x1
jax: 0.10.0
libtpu: 0.0.40
codegen_flags: <defaults>
</compile_context>

<pallas_src>
import jax
import jax.numpy as jnp
from jax.experimental import pallas as pl
from jax.experimental.pallas import tpu as pltpu


def _round_up(x, m):
    return ((x + m - 1) // m) * m


# ---------------------------------------------------------------------------
# Kernel 1: MLP trunk over the (reversed) relative-position table.
#   pos block : (rows_blk, 1)        f32, positions on sublanes
#   weights   : (in_f, dim), biases / LN params (1, dim)  -- VMEM resident
#   output    : (rows_blk, dim)      f32 trunk activations
# ---------------------------------------------------------------------------
def _make_trunk_kernel(depth, norm, log_distance, eps=1e-5):
    def kernel(*refs):
        idx = 0
        x = refs[idx][...].astype(jnp.float32)          # (rows_blk, 1)
        idx += 1
        if log_distance:
            x = jnp.sign(x) * jnp.log(jnp.abs(x) + 1.0)
        for layer in range(depth):
            w_ref, b_ref = refs[idx], refs[idx + 1]
            idx += 2
            if layer == 0:
                # Linear(1, dim) == broadcasted scale + shift (avoid K=1 matmul)
                x = x * w_ref[...] + b_ref[...]
            else:
                x = jnp.dot(x, w_ref[...],
                            preferred_element_type=jnp.float32) + b_ref[...]
            if norm:
                g_ref, beta_ref = refs[idx], refs[idx + 1]
                idx += 2
                mean = jnp.mean(x, axis=-1, keepdims=True)
                # one-pass variance: E[x^2] - mean^2 (halves XLU reductions)
                var = jnp.mean(x * x, axis=-1, keepdims=True) - mean * mean
                x = (x - mean) * jax.lax.rsqrt(var + eps) * g_ref[...] + beta_ref[...]
            x = jnp.maximum(x, 0.0)                      # ReLU
        refs[idx][...] = x                               # trunk table block (f32)
    return kernel


# ---------------------------------------------------------------------------
# Kernel 2: fused final Linear(dim, heads) + relative-position expansion.
# For output block (heads, ti, tj) at grid point (i0, j0):
#   window v  = trunk[wstart : wstart + win, :]      (8-aligned dynamic sublane slice)
#   yt        = wf @ v^T + bf                        -> (heads, win), lane-dense
#   out[:, a, :] = yt[:, ti-1-a : ti-1-a+tj]         (static lane slices)
# where bias[h, i, j] = FinalLinear(trunk(i - j))[h].
# ---------------------------------------------------------------------------
def _make_writer_kernel(base, ti, tj, win):
    def kernel(t_ref, wf_ref, bf_ref, out_ref):
        i0 = pl.program_id(0)
        j0 = pl.program_id(1)
        wstart = pl.multiple_of(base + j0 * tj - i0 * ti, 8)
        v = t_ref[pl.ds(wstart, win), :]                           # (win, dim)
        # (heads, dim) x (win, dim)^T -> (heads, win); transpose folded into MXU
        yt = jax.lax.dot_general(
            wf_ref[...], v,
            dimension_numbers=(((1,), (1,)), ((), ())),
            preferred_element_type=jnp.float32)
        yt = yt + bf_ref[...]                                      # (heads, 1) bcast
        for a in range(ti):                                        # static unroll
            off = ti - 1 - a
            out_ref[:, a, :] = yt[:, off:off + tj].astype(out_ref.dtype)
    return kernel


class DynamicPositionBiasPallas:
    """JAX/Pallas port of NeMo DynamicPositionBias with deterministic init."""

    def __init__(self, dim, *, heads, depth, log_distance=False, norm=False,
                 key=None):
        assert depth >= 1, "depth must be >= 1"
        self.dim, self.heads, self.depth = dim, heads, depth
        self.log_distance, self.norm = log_distance, norm
        if key is None:
            key = jax.random.PRNGKey(0)

        trunk = []
        in_f = 1
        for _ in range(depth):
            key, kw, kb = jax.random.split(key, 3)
            bound = 1.0 / (in_f ** 0.5)
            trunk.append(jax.random.uniform(kw, (in_f, dim), jnp.float32, -bound, bound))
            trunk.append(jax.random.uniform(kb, (1, dim), jnp.float32, -bound, bound))
            if norm:
                trunk.append(jnp.ones((1, dim), jnp.float32))
                trunk.append(jnp.zeros((1, dim), jnp.float32))
            in_f = dim
        key, kw, kb = jax.random.split(key, 3)
        bound = 1.0 / (dim ** 0.5)
        # final Linear stored in PyTorch (out, in) layout -> used directly by the writer
        self.wf = jax.random.uniform(kw, (heads, dim), jnp.float32, -bound, bound)
        self.bf = jax.random.uniform(kb, (heads, 1), jnp.float32, -bound, bound)
        self.trunk_params = tuple(trunk)

        self._fns = {}          # cache of jitted forwards, keyed by (n, dtype)

    # -- public API --------------------------------------------------------
    def __call__(self, n, dtype=jnp.float32):
        key = (int(n), jnp.dtype(dtype).name)
        fn = self._fns.get(key)
        if fn is None:
            fn = self._build(int(n), jnp.dtype(dtype))
            self._fns[key] = fn
        return fn(self.trunk_params, self.wf, self.bf)

    # -- build the two pallas_calls for a given (n, dtype) ------------------
    def _build(self, n, dtype):
        dim, heads, depth = self.dim, self.heads, self.depth
        norm, log_distance = self.norm, self.log_distance

        # ---- tiling of the (heads, n, n) output --------------------------
        ti = n if n <= 32 else 32            # output rows per block (sublanes)
        n_i_pad = _round_up(n, ti)
        tj = n if n <= 512 else 512          # output cols per block (lanes, dense)
        n_j_pad = _round_up(n, tj)

        pad = ti + ((-n) % 8)                # leading junk rows -> wstart 8-aligned
        base = n + pad - ti                  # == round_up(n, 8)
        win = _round_up(ti + tj - 1, 8)      # window rows needed per block

        # ---- trunk-table sizing ------------------------------------------
        l_need = base + (n_j_pad - tj) + win          # max wstart + win (exact)
        l_need = max(l_need, pad + 2 * n - 1)         # every real position present
        rows_blk = _round_up(l_need, 8) if l_need <= 1024 else 512
        l_pad = _round_up(l_need, rows_blk)

        # reversed positions: table row p holds relative position (n-1+pad) - p,
        # so bias[h, i, j] reads row  base + (ti-1-a) + b  for block-local (a, b).
        posvals = ((n - 1 + pad) - jnp.arange(l_pad, dtype=jnp.float32)
                   ).reshape(l_pad, 1)

        # ---- pallas_call #1: MLP trunk ------------------------------------
        param_shapes = []
        in_f = 1
        for _ in range(depth):
            param_shapes += [(in_f, dim), (1, dim)]
            if norm:
                param_shapes += [(1, dim), (1, dim)]
            in_f = dim

        trunk_in_specs = [pl.BlockSpec((rows_blk, 1), lambda r: (r, 0))]
        for shp in param_shapes:
            trunk_in_specs.append(pl.BlockSpec(shp, lambda r: (0, 0)))  # resident

        trunk_call = pl.pallas_call(
            _make_trunk_kernel(depth, norm, log_distance),
            out_shape=jax.ShapeDtypeStruct((l_pad, dim), jnp.float32),
            grid=(l_pad // rows_blk,),
            in_specs=trunk_in_specs,
            out_specs=pl.BlockSpec((rows_blk, dim), lambda r: (r, 0)),
            compiler_params=pltpu.CompilerParams(
                dimension_semantics=("parallel",)),
        )

        # ---- pallas_call #2: fused final linear + expansion ---------------
        # Blocks are small (heads*ti*tj*4B <= ~1 MiB even at large n), well under
        # the v7x 64 MiB / default-scoped VMEM limits; the trunk table stays
        # resident (l_pad * dim * 4B).
        writer_call = pl.pallas_call(
            _make_writer_kernel(base, ti, tj, win),
            out_shape=jax.ShapeDtypeStruct((heads, n_i_pad, n_j_pad), dtype),
            grid=(n_i_pad // ti, n_j_pad // tj),
            in_specs=[
                pl.BlockSpec((l_pad, dim), lambda i, j: (0, 0)),   # trunk table, resident
                pl.BlockSpec((heads, dim), lambda i, j: (0, 0)),   # final weight
                pl.BlockSpec((heads, 1), lambda i, j: (0, 0)),     # final bias
            ],
            out_specs=pl.BlockSpec((heads, ti, tj), lambda i, j: (0, i, j)),
            compiler_params=pltpu.CompilerParams(
                dimension_semantics=("parallel", "parallel")),
        )

        def forward(trunk_params, wf, bf):
            table = trunk_call(posvals, *trunk_params)          # (l_pad, dim) f32
            bias = writer_call(table, wf, bf)                   # (heads, n_i_pad, n_j_pad)
            if n_i_pad != n or n_j_pad != n:
                bias = bias[:, :n, :n]
            return bias

        return jax.jit(forward)


# ---------------------------------------------------------------------------
# Pure-JAX reference mirroring the PyTorch forward semantics.
# ---------------------------------------------------------------------------
def reference_forward(module, n, dtype=jnp.float32):
    pos = jnp.arange(-n + 1, n, dtype=jnp.float32).reshape(-1, 1)
    if module.log_distance:
        pos = jnp.sign(pos) * jnp.log(jnp.abs(pos) + 1.0)
    x = pos
    p, idx = module.trunk_params, 0
    for _ in range(module.depth):
        w, b = p[idx], p[idx + 1]
        idx += 2
        x = x @ w + b
        if module.norm:
            g, be = p[idx], p[idx + 1]
            idx += 2
            mean = x.mean(-1, keepdims=True)
            var = ((x - mean) ** 2).mean(-1, keepdims=True)
            x = (x - mean) / jnp.sqrt(var + 1e-5) * g + be
        x = jnp.maximum(x, 0.0)
    x = (x @ module.wf.T + module.bf[:, 0]).astype(dtype)        # (2n-1, heads)
    i = jnp.arange(n)
    indices = i[:, None] - i[None, :] + (n - 1)
    return jnp.transpose(x[indices], (2, 0, 1))                  # (heads, n, n)


if __name__ == "__main__":
    # Small shapes consistent with the module: hidden dim=32, heads=4, depth=2, n=8.
    dim, heads, depth, n = 32, 4, 2, 8

    module = DynamicPositionBiasPallas(
        dim, heads=heads, depth=depth, log_distance=False, norm=False,
        key=jax.random.PRNGKey(0))
    bias = jax.block_until_ready(module(n, dtype=jnp.float32))
    ref = reference_forward(module, n, dtype=jnp.float32)
    assert bias.shape == (heads, n, n), bias.shape
    assert jnp.allclose(bias, ref, atol=1e-3, rtol=1e-3), \
        f"max abs err = {jnp.abs(bias - ref).max()}"

    # Second config: exercises log_distance, LayerNorm and the in-kernel bf16 cast.
    module2 = DynamicPositionBiasPallas(
        dim, heads=heads, depth=depth, log_distance=True, norm=True,
        key=jax.random.PRNGKey(0))
    n2 = 12
    bias2 = jax.block_until_ready(module2(n2, dtype=jnp.bfloat16))
    ref2 = reference_forward(module2, n2, dtype=jnp.bfloat16)
    assert bias2.shape == (heads, n2, n2), bias2.shape
    assert jnp.allclose(bias2.astype(jnp.float32), ref2.astype(jnp.float32),
                        atol=5e-2, rtol=5e-2), \
        f"max abs err = {jnp.abs(bias2.astype(jnp.float32) - ref2.astype(jnp.float32)).max()}"

    print("KERNEL_OK")
</pallas_src>

<mosaic_0001>
module attributes {stable_mosaic.version = 11 : i64} {
  func.func @kernel(%arg0: i32, %arg1: memref<24x1xf32, #tpu.memory_space<vmem>>, %arg2: memref<1x32xf32, #tpu.memory_space<vmem>>, %arg3: memref<1x32xf32, #tpu.memory_space<vmem>>, %arg4: memref<32x32xf32, #tpu.memory_space<vmem>>, %arg5: memref<1x32xf32, #tpu.memory_space<vmem>>, %arg6: memref<24x32xf32, #tpu.memory_space<vmem>>) attributes {dimension_semantics = [#tpu.dimension_semantics<parallel>], iteration_bounds = array<i64: 1>, scalar_prefetch = 0 : i64, scratch_operands = 0 : i64, tpu.core_type = #tpu.core_type<tc>, window_params = [{transform_indices = @transform_0, window_bounds = array<i64: 24, 1>}, {pipeline_mode = #tpu.pipeline_mode<synchronous>, transform_indices = @transform_1, window_bounds = array<i64: 1, 32>}, {pipeline_mode = #tpu.pipeline_mode<synchronous>, transform_indices = @transform_2, window_bounds = array<i64: 1, 32>}, {pipeline_mode = #tpu.pipeline_mode<synchronous>, transform_indices = @transform_3, window_bounds = array<i64: 32, 32>}, {pipeline_mode = #tpu.pipeline_mode<synchronous>, transform_indices = @transform_4, window_bounds = array<i64: 1, 32>}, {transform_indices = @transform_5, window_bounds = array<i64: 24, 32>}]} {
    %c0 = arith.constant 0 : index
    %c0_0 = arith.constant 0 : index
    %0 = vector.load %arg1[%c0, %c0_0] : memref<24x1xf32, #tpu.memory_space<vmem>>, vector<24x1xf32>
    %c0_1 = arith.constant 0 : index
    %c0_2 = arith.constant 0 : index
    %1 = vector.load %arg2[%c0_1, %c0_2] : memref<1x32xf32, #tpu.memory_space<vmem>>, vector<1x32xf32>
    %2 = vector.broadcast %0 : vector<24x1xf32> to vector<24x32xf32>
    %3 = vector.broadcast %1 : vector<1x32xf32> to vector<24x32xf32>
    %4 = arith.mulf %2, %3 : vector<24x32xf32>
    %c0_3 = arith.constant 0 : index
    %c0_4 = arith.constant 0 : index
    %5 = vector.load %arg3[%c0_3, %c0_4] : memref<1x32xf32, #tpu.memory_space<vmem>>, vector<1x32xf32>
    %6 = vector.broadcast %5 : vector<1x32xf32> to vector<24x32xf32>
    %7 = arith.addf %4, %6 : vector<24x32xf32>
    %cst = arith.constant 0.000000e+00 : f32
    %8 = vector.broadcast %cst : f32 to vector<24x32xf32>
    %9 = arith.maximumf %7, %8 : vector<24x32xf32>
    %c0_5 = arith.constant 0 : index
    %c0_6 = arith.constant 0 : index
    %10 = vector.load %arg4[%c0_5, %c0_6] : memref<32x32xf32, #tpu.memory_space<vmem>>, vector<32x32xf32>
    %cst_7 = arith.constant dense<0.000000e+00> : vector<24x32xf32>
    %11 = tpu.matmul %9, %10, %cst_7 {dimension_numbers = #tpu.dot_dimension_numbers<[1], [0], [0], [1], [0, 0, 1, 1], [], []>} : vector<24x32xf32>, vector<32x32xf32>, vector<24x32xf32> -> vector<24x32xf32>
    %c0_8 = arith.constant 0 : index
    %c0_9 = arith.constant 0 : index
    %12 = vector.load %arg5[%c0_8, %c0_9] : memref<1x32xf32, #tpu.memory_space<vmem>>, vector<1x32xf32>
    %13 = vector.broadcast %12 : vector<1x32xf32> to vector<24x32xf32>
    %14 = arith.addf %11, %13 : vector<24x32xf32>
    %cst_10 = arith.constant 0.000000e+00 : f32
    %15 = vector.broadcast %cst_10 : f32 to vector<24x32xf32>
    %16 = arith.maximumf %14, %15 : vector<24x32xf32>
    %c0_11 = arith.constant 0 : index
    %c0_12 = arith.constant 0 : index
    %17 = vector.load %arg6[%c0_11, %c0_12] : memref<24x32xf32, #tpu.memory_space<vmem>>, vector<24x32xf32>
    tpu.vector_store %arg6[%c0_11, %c0_12], %16 {strides = array<i32>} : memref<24x32xf32, #tpu.memory_space<vmem>>, vector<24x32xf32>,
    return
  }
  func.func @transform_0(%arg0: i32) -> (i32, i32) {
    %c0_i32 = arith.constant 0 : i32
    %c0_i32_0 = arith.constant 0 : i32
    return %arg0, %c0_i32 : i32, i32
  }
  func.func @transform_1(%arg0: i32) -> (i32, i32) {
    %c0_i32 = arith.constant 0 : i32
    %c0_i32_0 = arith.constant 0 : i32
    %c0_i32_1 = arith.constant 0 : i32
    return %c0_i32, %c0_i32_0 : i32, i32
  }
  func.func @transform_2(%arg0: i32) -> (i32, i32) {
    %c0_i32 = arith.constant 0 : i32
    %c0_i32_0 = arith.constant 0 : i32
    %c0_i32_1 = arith.constant 0 : i32
    return %c0_i32, %c0_i32_0 : i32, i32
  }
  func.func @transform_3(%arg0: i32) -> (i32, i32) {
    %c0_i32 = arith.constant 0 : i32
    %c0_i32_0 = arith.constant 0 : i32
    %c0_i32_1 = arith.constant 0 : i32
    return %c0_i32, %c0_i32_0 : i32, i32
  }
  func.func @transform_4(%arg0: i32) -> (i32, i32) {
    %c0_i32 = arith.constant 0 : i32
    %c0_i32_0 = arith.constant 0 : i32
    %c0_i32_1 = arith.constant 0 : i32
    return %c0_i32, %c0_i32_0 : i32, i32
  }
  func.func @transform_5(%arg0: i32) -> (i32, i32) {
    %c0_i32 = arith.constant 0 : i32
    %c0_i32_0 = arith.constant 0 : i32
    return %arg0, %c0_i32 : i32, i32
  }
}

module attributes {stable_mosaic.version = 11 : i64} {
  func.func @kernel(%arg0: i32, %arg1: i32, %arg2: memref<24x32xf32, #tpu.memory_space<vmem>>, %arg3: memref<4x32xf32, #tpu.memory_space<vmem>>, %arg4: memref<4x1xf32, #tpu.memory_space<vmem>>, %arg5: memref<4x8x8xf32, #tpu.memory_space<vmem>>) attributes {dimension_semantics = [#tpu.dimension_semantics<parallel>, #tpu.dimension_semantics<parallel>], iteration_bounds = array<i64: 1, 1>, scalar_prefetch = 0 : i64, scratch_operands = 0 : i64, tpu.core_type = #tpu.core_type<tc>, window_params = [{pipeline_mode = #tpu.pipeline_mode<synchronous>, transform_indices = @transform_0, window_bounds = array<i64: 24, 32>}, {pipeline_mode = #tpu.pipeline_mode<synchronous>, transform_indices = @transform_1, window_bounds = array<i64: 4, 32>}, {pipeline_mode = #tpu.pipeline_mode<synchronous>, transform_indices = @transform_2, window_bounds = array<i64: 4, 1>}, {transform_indices = @transform_3, window_bounds = array<i64: 4, 8, 8>}]} {
    %c8_i32 = arith.constant 8 : i32
    %0 = arith.muli %arg1, %c8_i32 : i32
    %c8_i32_0 = arith.constant 8 : i32
    %1 = arith.addi %c8_i32_0, %0 : i32
    %c8_i32_1 = arith.constant 8 : i32
    %2 = arith.muli %arg0, %c8_i32_1 : i32
    %3 = arith.subi %1, %2 : i32
    %4 = tpu.assume_multiple %3, 8 : i32
    %5 = arith.index_cast %4 : i32 to index
    %c0 = arith.constant 0 : index
    %6 = vector.load %arg2[%5, %c0] : memref<24x32xf32, #tpu.memory_space<vmem>>, vector<16x32xf32>
    %c0_2 = arith.constant 0 : index
    %c0_3 = arith.constant 0 : index
    %7 = vector.load %arg3[%c0_2, %c0_3] : memref<4x32xf32, #tpu.memory_space<vmem>>, vector<4x32xf32>
    %cst = arith.constant dense<0.000000e+00> : vector<4x16xf32>
    %8 = tpu.matmul %7, %6, %cst {dimension_numbers = #tpu.dot_dimension_numbers<[1], [1], [0], [0], [0, 0, 1, 0], [], []>} : vector<4x32xf32>, vector<16x32xf32>, vector<4x16xf32> -> vector<4x16xf32>
    %c0_4 = arith.constant 0 : index
    %c0_5 = arith.constant 0 : index
    %9 = vector.load %arg4[%c0_4, %c0_5] : memref<4x1xf32, #tpu.memory_space<vmem>>, vector<4x1xf32>
    %10 = vector.broadcast %9 : vector<4x1xf32> to vector<4x16xf32>
    %11 = arith.addf %8, %10 : vector<4x16xf32>
    %12 = vector.extract_strided_slice %11 {offsets = [0, 7], sizes = [4, 8], strides = [1, 1]} : vector<4x16xf32> to vector<4x8xf32>
    %c0_6 = arith.constant 0 : index
    %c0_7 = arith.constant 0 : index
    %c0_8 = arith.constant 0 : index
    %13 = vector.load %arg5[%c0_6, %c0_7, %c0_8] : memref<4x8x8xf32, #tpu.memory_space<vmem>>, vector<4x1x8xf32>
    %14 = vector.shape_cast %13 : vector<4x1x8xf32> to vector<4x8xf32>
    %15 = vector.shape_cast %12 : vector<4x8xf32> to vector<4x1x8xf32>
    tpu.vector_store %arg5[%c0_6, %c0_7, %c0_8], %15 {strides = array<i32>} : memref<4x8x8xf32, #tpu.memory_space<vmem>>, vector<4x1x8xf32>,
    %16 = vector.extract_strided_slice %11 {offsets = [0, 6], sizes = [4, 8], strides = [1, 1]} : vector<4x16xf32> to vector<4x8xf32>
    %c0_9 = arith.constant 0 : index
    %c1 = arith.constant 1 : index
    %c0_10 = arith.constant 0 : index
    %17 = vector.load %arg5[%c0_9, %c1, %c0_10] : memref<4x8x8xf32, #tpu.memory_space<vmem>>, vector<4x1x8xf32>
    %18 = vector.shape_cast %17 : vector<4x1x8xf32> to vector<4x8xf32>
    %19 = vector.shape_cast %16 : vector<4x8xf32> to vector<4x1x8xf32>
    tpu.vector_store %arg5[%c0_9, %c1, %c0_10], %19 {strides = array<i32>} : memref<4x8x8xf32, #tpu.memory_space<vmem>>, vector<4x1x8xf32>,
    %20 = vector.extract_strided_slice %11 {offsets = [0, 5], sizes = [4, 8], strides = [1, 1]} : vector<4x16xf32> to vector<4x8xf32>
    %c0_11 = arith.constant 0 : index
    %c2 = arith.constant 2 : index
    %c0_12 = arith.constant 0 : index
    %21 = vector.load %arg5[%c0_11, %c2, %c0_12] : memref<4x8x8xf32, #tpu.memory_space<vmem>>, vector<4x1x8xf32>
    %22 = vector.shape_cast %21 : vector<4x1x8xf32> to vector<4x8xf32>
    %23 = vector.shape_cast %20 : vector<4x8xf32> to vector<4x1x8xf32>
    tpu.vector_store %arg5[%c0_11, %c2, %c0_12], %23 {strides = array<i32>} : memref<4x8x8xf32, #tpu.memory_space<vmem>>, vector<4x1x8xf32>,
    %24 = vector.extract_strided_slice %11 {offsets = [0, 4], sizes = [4, 8], strides = [1, 1]} : vector<4x16xf32> to vector<4x8xf32>
    %c0_13 = arith.constant 0 : index
    %c3 = arith.constant 3 : index
    %c0_14 = arith.constant 0 : index
    %25 = vector.load %arg5[%c0_13, %c3, %c0_14] : memref<4x8x8xf32, #tpu.memory_space<vmem>>, vector<4x1x8xf32>
    %26 = vector.shape_cast %25 : vector<4x1x8xf32> to vector<4x8xf32>
    %27 = vector.shape_cast %24 : vector<4x8xf32> to vector<4x1x8xf32>
    tpu.vector_store %arg5[%c0_13, %c3, %c0_14], %27 {strides = array<i32>} : memref<4x8x8xf32, #tpu.memory_space<vmem>>, vector<4x1x8xf32>,
    %28 = vector.extract_strided_slice %11 {offsets = [0, 3], sizes = [4, 8], strides = [1, 1]} : vector<4x16xf32> to vector<4x8xf32>
    %c0_15 = arith.constant 0 : index
    %c4 = arith.constant 4 : index
    %c0_16 = arith.constant 0 : index
    %29 = vector.load %arg5[%c0_15, %c4, %c0_16] : memref<4x8x8xf32, #tpu.memory_space<vmem>>, vector<4x1x8xf32>
    %30 = vector.shape_cast %29 : vector<4x1x8xf32> to vector<4x8xf32>
    %31 = vector.shape_cast %28 : vector<4x8xf32> to vector<4x1x8xf32>
    tpu.vector_store %arg5[%c0_15, %c4, %c0_16], %31 {strides = array<i32>} : memref<4x8x8xf32, #tpu.memory_space<vmem>>, vector<4x1x8xf32>,
    %32 = vector.extract_strided_slice %11 {offsets = [0, 2], sizes = [4, 8], strides = [1, 1]} : vector<4x16xf32> to vector<4x8xf32>
    %c0_17 = arith.constant 0 : index
    %c5 = arith.constant 5 : index
    %c0_18 = arith.constant 0 : index
    %33 = vector.load %arg5[%c0_17, %c5, %c0_18] : memref<4x8x8xf32, #tpu.memory_space<vmem>>, vector<4x1x8xf32>
    %34 = vector.shape_cast %33 : vector<4x1x8xf32> to vector<4x8xf32>
    %35 = vector.shape_cast %32 : vector<4x8xf32> to vector<4x1x8xf32>
    tpu.vector_store %arg5[%c0_17, %c5, %c0_18], %35 {strides = array<i32>} : memref<4x8x8xf32, #tpu.memory_space<vmem>>, vector<4x1x8xf32>,
    %36 = vector.extract_strided_slice %11 {offsets = [0, 1], sizes = [4, 8], strides = [1, 1]} : vector<4x16xf32> to vector<4x8xf32>
    %c0_19 = arith.constant 0 : index
    %c6 = arith.constant 6 : index
    %c0_20 = arith.constant 0 : index
    %37 = vector.load %arg5[%c0_19, %c6, %c0_20] : memref<4x8x8xf32, #tpu.memory_space<vmem>>, vector<4x1x8xf32>
    %38 = vector.shape_cast %37 : vector<4x1x8xf32> to vector<4x8xf32>
    %39 = vector.shape_cast %36 : vector<4x8xf32> to vector<4x1x8xf32>
    tpu.vector_store %arg5[%c0_19, %c6, %c0_20], %39 {strides = array<i32>} : memref<4x8x8xf32, #tpu.memory_space<vmem>>, vector<4x1x8xf32>,
    %40 = vector.extract_strided_slice %11 {offsets = [0, 0], sizes = [4, 8], strides = [1, 1]} : vector<4x16xf32> to vector<4x8xf32>
    %c0_21 = arith.constant 0 : index
    %c7 = arith.constant 7 : index
    %c0_22 = arith.constant 0 : index
    %41 = vector.load %arg5[%c0_21, %c7, %c0_22] : memref<4x8x8xf32, #tpu.memory_space<vmem>>, vector<4x1x8xf32>
    %42 = vector.shape_cast %41 : vector<4x1x8xf32> to vector<4x8xf32>
    %43 = vector.shape_cast %40 : vector<4x8xf32> to vector<4x1x8xf32>
    tpu.vector_store %arg5[%c0_21, %c7, %c0_22], %43 {strides = array<i32>} : memref<4x8x8xf32, #tpu.memory_space<vmem>>, vector<4x1x8xf32>,
    return
  }
  func.func @transform_0(%arg0: i32, %arg1: i32) -> (i32, i32) {
    %c0_i32 = arith.constant 0 : i32
    %c0_i32_0 = arith.constant 0 : i32
    %c0_i32_1 = arith.constant 0 : i32
    return %c0_i32, %c0_i32_0 : i32, i32
  }
  func.func @transform_1(%arg0: i32, %arg1: i32) -> (i32, i32) {
    %c0_i32 = arith.constant 0 : i32
    %c0_i32_0 = arith.constant 0 : i32
    %c0_i32_1 = arith.constant 0 : i32
    return %c0_i32, %c0_i32_0 : i32, i32
  }
  func.func @transform_2(%arg0: i32, %arg1: i32) -> (i32, i32) {
    %c0_i32 = arith.constant 0 : i32
    %c0_i32_0 = arith.constant 0 : i32
    %c0_i32_1 = arith.constant 0 : i32
    return %c0_i32, %c0_i32_0 : i32, i32
  }
  func.func @transform_3(%arg0: i32, %arg1: i32) -> (i32, i32, i32) {
    %c0_i32 = arith.constant 0 : i32
    %c0_i32_0 = arith.constant 0 : i32
    return %c0_i32, %arg0, %arg1 : i32, i32, i32
  }
}

</mosaic_0001>

<bundles_post_ra>
// kernel: forward.2
= control target key start
LH: loop header
LB: loop body
LE: loop exit
PB: predicated region body
PF: predicated region fallthrough
CT: control target
= control target key end

     0   :  { %10 = vsyncpa [#allocation3], 0  ;;  %s260_s18 = smov [#allocation2]   ;;  %s345_s0 = inlined_call_operand.vmem [shape: f32[24,1], index: 0, kind: input, shape index: {}]   ;;  %s346_s1 = inlined_call_operand.vmem [shape: f32[1,32], index: 1, kind: input, shape index: {}]   ;;  %s347_s2 = inlined_call_operand.vmem [shape: f32[1,32], index: 2, kind: input, shape index: {}]   ;;  %s348_s3 = inlined_call_operand.hbm [shape: f32[32,32], index: 3, kind: input, shape index: {}]   ;;  %s349_s4 = inlined_call_operand.vmem [shape: f32[1,32], index: 4, kind: input, shape index: {}]   ;;  %s350_s5 = inlined_call_operand.vmem [shape: f32[24,32], index: 5, kind: output, shape index: {}]  }
   0x1   :  { %s22_s19 = sshll.u32 %s260_s18, 4  ;;  %s236_s22 = scalar_lea.hbm %s348_s3, 512  ;;  %s23_s19 = int_to_ptr.vmem [resolvable:$true] %s22_s19 }
   0x2   :  { %p237_p0 = scmp.ne.s32.totalorder %s348_s3, %s236_s22  ;;  %p240_p1 = scmp.lt.u32.totalorder %s236_s22, %s348_s3 }
   0x4   :  { %p242_p2 = pnand %p240_p1, %p237_p0 }
   0x6   :  { %245 = shalt.err (!%p242_p2)
}
   0x7   :  { %s246_s27 = scalar_lea.vmem %s23_s19, 512  ;;  %p251_p4 = scmp.lt.s32.totalorder %s23_s19, %s23_s19 }
   0x8   :  { %p247_p3 = scmp.ne.s32.totalorder %s23_s19, %s246_s27  ;;  %p252_p5 = scmp.lt.s32.totalorder %s246_s27, %s246_s27 }
   0xa   :  { %p253_p6 = por %p252_p5, %p251_p4 }
   0xc   :  { %p254_p7 = pnand %p253_p6, %p247_p3 }
   0xe   :  { %257 = shalt.err (!%p254_p7)
}
   0xf   :  { %s261_s28 = smov 128   ;;  %s262_s29 = smov 8  }
  0x10   :  { %28 = dma.hbm_to_vmem [thread:$0]  %s348_s3, 512, %s23_s19, [#allocation3], %s261_s28, %s261_s28, %s262_s29  }
  0x11   :  { %258 = dma.done.wait [#allocation3], 512  }
  0x12   :  { %259 = vsyncadd [#allocation3], 4294966784  ;;  %v263_v0 = vmov 0   ;;  %v264_v1 = vmov 0.0|0.0   ;;  %v35_v2 = vld [vmem:[%s345_s0 + $0x8] sm:$0xff]  ;;  %v36_v3 = vld [vmem:[%s345_s0 + $0x10] sm:$0xff] }
  0x13   :  { %234 = vset.pattern.permute.xlu0 %v263_v0  ;;  %235 = vset.pattern.permute.xlu1 %v263_v0  ;;  %v75_v4 = vld [vmem:[#allocation2] sm:$0xff]  ;;  %v76_v5 = vld [vmem:[#allocation2 + $0x8] sm:$0xff]  ;;  %v77_v8 = vld [vmem:[#allocation2 + $0x10] sm:$0xff]  ;;  %vm265_vm0 = vmmov 0   ;;  %v266_v11 = vmov 0.0   ;;  %vm86_vm1 = vcmask 261120  }
  0x14   :  { %223 = vmatprep.subr.bf16.mxu1 %v264_v1  ;;  %217 = vmatprep.subr.bf16.mxu0 %v264_v1  ;;  %v34_v6 = vld [vmem:[%s345_s0] sm:$0xff]  ;;  %v218_v7 = vpack.c.bf16 %v76_v5, %v75_v4  ;;  %v78_v9 = vld [vmem:[#allocation2 + $0x18] sm:$0xff] }
  0x15   :  { %45 = vperm.xlu0 %234, %v35_v2   ;;  %50 = vperm.xlu1 %235, %v36_v3   ;;  %v221_v10 = vpack.c.bf16 %v78_v9, %v77_v8  ;;  %v187_v12 = vld [vmem:[%s346_s1] ss:$0 sm:$0xff] }
  0x16   :  { %225 = vmatpush3.bf16.msra.mxu1 %v218_v7  ;;  %219 = vmatpush3.bf16.msra.mxu0 %v218_v7  ;;  %v188_v13 = vld [vmem:[%s347_s2] ss:$0 sm:$0xff] }
  0x17   :  { %224 = vmatprep.subr.bf16.mxu1 %v264_v1  ;;  %211 = vmatprep.mubr.msk.f32.mxu1 %vm265_vm0, %v266_v11  ;;  %v189_v26 = vld [vmem:[%s349_s4] ss:$0 sm:$0xff] }
  0x18   :  { %220 = vmatprep.subr.bf16.mxu0 %v264_v1  ;;  %208 = vmatprep.mubr.msk.f32.mxu0 %vm265_vm0, %v266_v11 }
  0x19   :  { %40 = vperm.xlu0 %234, %v34_v6  }
  0x1a   :  { %226 = vmatpush3.bf16.msra.mxu1 %v221_v10  ;;  %222 = vmatpush3.bf16.msra.mxu0 %v221_v10 }
  0x94   :  { %v46_v14 = vpop.permute.xlu0 %45  ;;  %v51_v15 = vpop.permute.xlu1 %50 }
  0x95   :  { %v60_v16 = vmul.f32 %v187_v12, %v46_v14  ;;  %v61_v17 = vmul.f32 %v187_v12, %v51_v15 }
  0x97   :  { %v70_v18 = vadd.f32 %v188_v13, %v60_v16  ;;  %v71_v19 = vadd.f32 %v188_v13, %v61_v17 }
  0x98   :  { %v41_v20 = vpop.permute.xlu0 %40 }
  0x99   :  { %v73_v21 = vmax.f32 %v70_v18, 0.0  ;;  %v59_v22 = vmul.f32 %v187_v12, %v41_v20  ;;  %v74_v23 = vmax.f32 %v71_v19, 0.0 }
  0x9b   :  { %v69_v24 = vadd.f32 %v188_v13, %v59_v22  ;;  %212 = vmatmul.mubr.msk.f32.vlgmr.msra.gmra.mrb[0].mxu1 %vm86_vm1, %v73_v21 }
  0x9c   :  { %214 = vmatprep.mubr.msk.f32.mxu1 %vm265_vm0, %v266_v11 }
  0x9d   :  { %v72_v25 = vmax.f32 %v69_v24, 0.0 }
  0x9f   :  { %209 = vmatmul.mubr.msk.f32.vlgmr.msra.gmra.mrb[0].mxu0 %vm86_vm1, %v72_v25  ;;  %215 = vmatmul.mubr.msk.f32.gmra.mrb[2].mxu1 %vm86_vm1, %v74_v23 }
 0x16e   :  { %v167_v27 = vpop.f32.mrb[0].mxu1 }
 0x16f   :  { %v168_v28 = vadd.f32 %v189_v26, %v167_v27  ;;  %v213_v29 = vpop.f32.mrb[1].mxu1 }
 0x171   :  { %v177_v30 = vmax.f32 %v168_v28, 0.0 }
 0x172   :  { %v162_v31 = vpop.f32.mrb[0].mxu0  ;;  %v172_v32 = vpop.f32.mrb[2].mxu1 }
 0x173   :  { %180 = vst.msk [vmem:[%s350_s5 + $0x8] sm:$0xff] %vm86_vm1, %v177_v30  ;;  %v163_v33 = vadd.f32 %v189_v26, %v162_v31  ;;  %v173_v34 = vadd.f32 %v189_v26, %v172_v32  ;;  %v210_v35 = vpop.f32.mrb[1].mxu0  ;;  %v216_v36 = vpop.f32.mrb[3].mxu1 }
 0x175   :  { %v176_v37 = vmax.f32 %v163_v33, 0.0  ;;  %v178_v38 = vmax.f32 %v173_v34, 0.0 }
 0x177   :  { %179 = vst.msk [vmem:[%s350_s5] sm:$0xff] %vm86_vm1, %v176_v37  ;;  %181 = vst.msk [vmem:[%s350_s5 + $0x10] sm:$0xff] %vm86_vm1, %v178_v38 }
 0x178   :  { %186 = vsyncpa [#allocation3], 1 }

// kernel: forward.3
= control target key start
LH: loop header
LB: loop body
LE: loop exit
PB: predicated region body
PF: predicated region fallthrough
CT: control target
= control target key end

     0   :  { %vm29_vm0 = vcmask 261120   ;;  %v347_v2 = vmov 0.0|0.0   ;;  %vm348_vm2 = vmmov 0   ;;  %v349_v4 = vmov 0.0   ;;  %s438_s0 = inlined_call_operand.vmem [shape: f32[24,32], index: 0, kind: input, shape index: {}]   ;;  %s439_s1 = inlined_call_operand.vmem [shape: f32[4,32], index: 1, kind: input, shape index: {}]   ;;  %s440_s2 = inlined_call_operand.vmem [shape: f32[4,1], index: 2, kind: input, shape index: {}]   ;;  %s441_s3 = inlined_call_operand.hbm [shape: f32[4,8,8], index: 3, kind: output, shape index: {}]  }
   0x1   :  { %v288_v0 = vld [vmem:[%s438_s0 + $0x8] sm:$0xff]  ;;  %v289_v1 = vld [vmem:[%s438_s0 + $0x10] sm:$0xff]  ;;  %303 = vmatprep.subr.bf16.mxu0 %v347_v2  ;;  %vm305_vm1 = vmpackc.low %vm29_vm0, %vm29_vm0  ;;  %300 = vmatprep.mubr.msk.f32.mxu0 %vm348_vm2, %v349_v4  ;;  %v350_v6 = vmov 0  }
   0x2   :  { %v304_v3 = vpack.c.bf16 %v289_v1, %v288_v0  ;;  %v23_v5 = vld [vmem:[%s440_s2] sm:$0xf]  ;;  %322 = vset.pattern.permute.xlu0 %v350_v6 }
   0x3   :  { %8 = vsyncpa [#allocation3], 0  ;;  %26 = vperm.xlu0 %322, %v23_v5   ;;  %v22_v7 = vld [vmem:[%s439_s1] sm:$0xf]  ;;  %v351_v8 = vmov 1966171168   ;;  %v113_v10 = vlaneseq }
   0x4   :  { %306 = vmatpush3.bf16.xpose.msk.msra.mxu0 %vm305_vm1, %v304_v3  ;;  %v111_v9 = vunpack.c.l.s4 %v351_v8  ;;  %vm162_vm3 = vcmask 57344   ;;  %s352_s0 = smov 122   ;;  %s353_s1 = smov 121  }
   0x5   :  { %v114_v12 = vshrl.u32 %v113_v10, 7  ;;  %s354_s2 = smov 123   ;;  %s355_s20 = smov 124  }
   0x6   :  { %v112_v11 = vunpack.c.0.s8 %v111_v9  ;;  %s356_s21 = smov 125   ;;  %s357_s22 = smov 126  }
   0x7   :  { %v136_v19 = vsub.s32 0, %v114_v12  ;;  %s358_s23 = smov 127   ;;  %s359_s24 = smov [#allocation2]  }
   0x8   :  { %v115_v14 = vsub.s32 %v112_v11, %v114_v12  ;;  %s276_s25 = sshll.u32 %s359_s24, 4  ;;  %s277_s25 = int_to_ptr.vmem [resolvable:$true] %s276_s25 }
   0x9   :  { %s323_s26 = scalar_lea.vmem %s277_s25, 512  ;;  %p328_p1 = scmp.lt.s32.totalorder %s277_s25, %s277_s25 }
   0xa   :  { %p324_p0 = scmp.ne.s32.totalorder %s277_s25, %s323_s26  ;;  %p329_p2 = scmp.lt.s32.totalorder %s323_s26, %s323_s26 }
   0xb   :  { %301 = vmatmul.mubr.msk.f32.vlgmr.msra.gmra.mrb[0].mxu0 %vm29_vm0, %v22_v7 }
   0xc   :  { %p330_p3 = por %p329_p2, %p328_p1 }
   0xe   :  { %p331_p4 = pnand %p330_p3, %p324_p0 }
  0x82   :  { %v27_v13 = vpop.permute.xlu0 %26 }
  0xde   :  { %v105_v15 = vpop.f32.mrb[0].mxu0 }
  0xdf   :  { %v106_v16 = vadd.f32 %v105_v15, %v27_v13  ;;  %v302_v17 = vpop.f32.mrb[1].mxu0 }
  0xe1   :  { %v116_v18 = vrot.slane %v106_v16, %v115_v14 }
  0xe3   :  { %v117_v20 = vcombine.high %v116_v18, %v116_v18  ;;  %v124_v21 = vrot.slane %v116_v18, %v115_v14 }
  0xe5   :  { %v131_v22 = vrot.slane %v117_v20, %v115_v14  ;;  %v132_v23 = vcombine.high %v124_v21, %v124_v21  ;;  %v137_v24 = vrot.slane %v124_v21, %v136_v19  ;;  %267 = vst.msk [vmem:[#allocation2 + $0x7] sm:$0x1] %vm162_vm3, %v124_v21 }
  0xe7   :  { %v133_v25 = vcombine.high %v131_v22, %v131_v22  ;;  %268 = vst.msk [vmem:[#allocation2 + $0xf] sm:$0x1] %vm162_vm3, %v131_v22  ;;  %269 = vst.msk [vmem:[#allocation2 + $0x17] sm:$0x1] %vm162_vm3, %v132_v23  ;;  %167 = vrot.lane.b32.xlu1 %v137_v24, %s352_s0  ;;  %150 = vrot.lane.b32.xlu0 %v137_v24, %s353_s1  ;;  %v141_v26 = vrot.slane %v131_v22, %v136_v19 }
  0xe8   :  { %v145_v27 = vrot.slane %v132_v23, %v136_v19 }
  0xe9   :  { %270 = vst.msk [vmem:[#allocation2 + $0x1f] sm:$0x1] %vm162_vm3, %v133_v25  ;;  %v149_v28 = vrot.slane %v133_v25, %v136_v19 }
  0xeb   :  { %183 = vrot.lane.b32.xlu1 %v137_v24, %s354_s2  ;;  %169 = vrot.lane.b32.xlu0 %v141_v26, %s352_s0 }
  0xef   :  { %199 = vrot.lane.b32.xlu1 %v137_v24, %s355_s20  ;;  %185 = vrot.lane.b32.xlu0 %v141_v26, %s354_s2 }
  0xf3   :  { %215 = vrot.lane.b32.xlu1 %v137_v24, %s356_s21  ;;  %201 = vrot.lane.b32.xlu0 %v141_v26, %s355_s20 }
  0xf7   :  { %231 = vrot.lane.b32.xlu1 %v137_v24, %s357_s22  ;;  %217 = vrot.lane.b32.xlu0 %v141_v26, %s356_s21 }
  0xfb   :  { %247 = vrot.lane.b32.xlu1 %v137_v24, %s358_s23  ;;  %233 = vrot.lane.b32.xlu0 %v141_v26, %s357_s22 }
  0xff   :  { %249 = vrot.lane.b32.xlu0 %v141_v26, %s358_s23  ;;  %152 = vrot.lane.b32.xlu1 %v141_v26, %s353_s1 }
 0x103   :  { %154 = vrot.lane.b32.xlu1 %v145_v27, %s353_s1  ;;  %156 = vrot.lane.b32.xlu0 %v149_v28, %s353_s1 }
 0x107   :  { %171 = vrot.lane.b32.xlu1 %v145_v27, %s352_s0  ;;  %173 = vrot.lane.b32.xlu0 %v149_v28, %s352_s0 }
 0x10b   :  { %187 = vrot.lane.b32.xlu1 %v145_v27, %s354_s2  ;;  %189 = vrot.lane.b32.xlu0 %v149_v28, %s354_s2 }
 0x10f   :  { %203 = vrot.lane.b32.xlu1 %v145_v27, %s355_s20  ;;  %205 = vrot.lane.b32.xlu0 %v149_v28, %s355_s20 }
 0x113   :  { %219 = vrot.lane.b32.xlu1 %v145_v27, %s356_s21  ;;  %221 = vrot.lane.b32.xlu0 %v149_v28, %s356_s21 }
 0x117   :  { %235 = vrot.lane.b32.xlu1 %v145_v27, %s357_s22  ;;  %237 = vrot.lane.b32.xlu0 %v149_v28, %s357_s22 }
 0x11b   :  { %251 = vrot.lane.b32.xlu1 %v145_v27, %s358_s23  ;;  %253 = vrot.lane.b32.xlu0 %v149_v28, %s358_s23 }
 0x159   :  { %v168_v29 = vpop.permute.xlu1 %167  ;;  %v151_v30 = vpop.permute.xlu0 %150 }
 0x15a   :  { %179 = vst.msk [vmem:[#allocation2 + $0x1] sm:$0x1] %vm162_vm3, %v168_v29  ;;  %163 = vst.msk [vmem:[#allocation2] sm:$0x1] %vm162_vm3, %v151_v30 }
 0x15d   :  { %v184_v31 = vpop.permute.xlu1 %183  ;;  %v170_v32 = vpop.permute.xlu0 %169 }
 0x15e   :  { %195 = vst.msk [vmem:[#allocation2 + $0x2] sm:$0x1] %vm162_vm3, %v184_v31  ;;  %180 = vst.msk [vmem:[#allocation2 + $0x9] sm:$0x1] %vm162_vm3, %v170_v32 }
 0x161   :  { %v200_v33 = vpop.permute.xlu1 %199  ;;  %v186_v34 = vpop.permute.xlu0 %185 }
 0x162   :  { %211 = vst.msk [vmem:[#allocation2 + $0x3] sm:$0x1] %vm162_vm3, %v200_v33  ;;  %196 = vst.msk [vmem:[#allocation2 + $0xa] sm:$0x1] %vm162_vm3, %v186_v34 }
 0x165   :  { %v216_v35 = vpop.permute.xlu1 %215  ;;  %v202_v36 = vpop.permute.xlu0 %201 }
 0x166   :  { %227 = vst.msk [vmem:[#allocation2 + $0x4] sm:$0x1] %vm162_vm3, %v216_v35  ;;  %212 = vst.msk [vmem:[#allocation2 + $0xb] sm:$0x1] %vm162_vm3, %v202_v36 }
 0x169   :  { %v232_v37 = vpop.permute.xlu1 %231  ;;  %v218_v38 = vpop.permute.xlu0 %217 }
 0x16a   :  { %243 = vst.msk [vmem:[#allocation2 + $0x5] sm:$0x1] %vm162_vm3, %v232_v37  ;;  %228 = vst.msk [vmem:[#allocation2 + $0xc] sm:$0x1] %vm162_vm3, %v218_v38 }
 0x16d   :  { %v248_v39 = vpop.permute.xlu1 %247  ;;  %v234_v40 = vpop.permute.xlu0 %233 }
 0x16e   :  { %259 = vst.msk [vmem:[#allocation2 + $0x6] sm:$0x1] %vm162_vm3, %v248_v39  ;;  %244 = vst.msk [vmem:[#allocation2 + $0xd] sm:$0x1] %vm162_vm3, %v234_v40 }
 0x171   :  { %v250_v41 = vpop.permute.xlu0 %249  ;;  %v153_v42 = vpop.permute.xlu1 %152 }
 0x172   :  { %260 = vst.msk [vmem:[#allocation2 + $0xe] sm:$0x1] %vm162_vm3, %v250_v41  ;;  %164 = vst.msk [vmem:[#allocation2 + $0x8] sm:$0x1] %vm162_vm3, %v153_v42 }
 0x175   :  { %v155_v43 = vpop.permute.xlu1 %154  ;;  %v157_v44 = vpop.permute.xlu0 %156 }
 0x176   :  { %165 = vst.msk [vmem:[#allocation2 + $0x10] sm:$0x1] %vm162_vm3, %v155_v43  ;;  %166 = vst.msk [vmem:[#allocation2 + $0x18] sm:$0x1] %vm162_vm3, %v157_v44 }
 0x179   :  { %v172_v45 = vpop.permute.xlu1 %171  ;;  %v174_v46 = vpop.permute.xlu0 %173 }
 0x17a   :  { %181 = vst.msk [vmem:[#allocation2 + $0x11] sm:$0x1] %vm162_vm3, %v172_v45  ;;  %182 = vst.msk [vmem:[#allocation2 + $0x19] sm:$0x1] %vm162_vm3, %v174_v46 }
 0x17d   :  { %v188_v47 = vpop.permute.xlu1 %187  ;;  %v190_v48 = vpop.permute.xlu0 %189 }
 0x17e   :  { %197 = vst.msk [vmem:[#allocation2 + $0x12] sm:$0x1] %vm162_vm3, %v188_v47  ;;  %198 = vst.msk [vmem:[#allocation2 + $0x1a] sm:$0x1] %vm162_vm3, %v190_v48 }
 0x181   :  { %v204_v49 = vpop.permute.xlu1 %203  ;;  %v206_v50 = vpop.permute.xlu0 %205 }
 0x182   :  { %213 = vst.msk [vmem:[#allocation2 + $0x13] sm:$0x1] %vm162_vm3, %v204_v49  ;;  %214 = vst.msk [vmem:[#allocation2 + $0x1b] sm:$0x1] %vm162_vm3, %v206_v50 }
 0x185   :  { %v220_v51 = vpop.permute.xlu1 %219  ;;  %v222_v52 = vpop.permute.xlu0 %221 }
 0x186   :  { %229 = vst.msk [vmem:[#allocation2 + $0x14] sm:$0x1] %vm162_vm3, %v220_v51  ;;  %230 = vst.msk [vmem:[#allocation2 + $0x1c] sm:$0x1] %vm162_vm3, %v222_v52 }
 0x189   :  { %v236_v53 = vpop.permute.xlu1 %235  ;;  %v238_v54 = vpop.permute.xlu0 %237 }
 0x18a   :  { %245 = vst.msk [vmem:[#allocation2 + $0x15] sm:$0x1] %vm162_vm3, %v236_v53  ;;  %246 = vst.msk [vmem:[#allocation2 + $0x1d] sm:$0x1] %vm162_vm3, %v238_v54 }
 0x18d   :  { %v252_v55 = vpop.permute.xlu1 %251  ;;  %v254_v56 = vpop.permute.xlu0 %253 }
 0x18e   :  { %261 = vst.msk [vmem:[#allocation2 + $0x16] sm:$0x1] %vm162_vm3, %v252_v55  ;;  %262 = vst.msk [vmem:[#allocation2 + $0x1e] sm:$0x1] %vm162_vm3, %v254_v56 }
 0x18f   :  { %334 = shalt.err (!%p331_p4)
}
 0x190   :  { %s335_s29 = scalar_lea.hbm %s441_s3, 512 }
 0x191   :  { %p336_p5 = scmp.ne.s32.totalorder %s441_s3, %s335_s29  ;;  %p339_p6 = scmp.lt.u32.totalorder %s335_s29, %s441_s3 }
 0x193   :  { %p341_p7 = pnand %p339_p6, %p336_p5 }
 0x195   :  { %344 = shalt.err (!%p341_p7)
}
 0x196   :  { %s360_s7 = smov 128   ;;  %s361_s8 = smov 8  }
 0x197   :  { %282 = dma.vmem_to_hbm [thread:$0]  %s277_s25, 512, %s441_s3, [#allocation3], %s360_s7, %s360_s7, %s361_s8  }
 0x198   :  { %345 = dma.done.wait [#allocation3], 512  }
 0x199   :  { %346 = vsyncadd [#allocation3], 4294966784 }
 0x19a   :  { %286 = vsyncpa [#allocation3], 1 }

</bundles_post_ra>
